<compile_context>
chip_gen: v5e
topology: v5e:2x2
jax: 0.10.0
libtpu: 0.0.40
codegen_flags: <defaults>
</compile_context>

<pallas_src>
import functools

import jax
import jax.numpy as jnp
from jax.experimental import pallas as pl
from jax.experimental.pallas import tpu as pltpu

IN_DIM = 4
K_PAD = 8          # layer-1 contraction padded to a full sublane tile for the MXU
HIDDEN = 128
N_ACTIONS = 2


def policy_kernel(x_ref, w1_ref, b1_ref, w2_ref, b2_ref, out_ref):
    # Batch-on-lanes layout:
    #   x_ref : (8, TB)      w1_ref: (128, 8)   b1_ref: (128, 1)
    #   w2_ref: (2, 128)     b2_ref: (2, 1)     out_ref: (2, TB)
    xt = x_ref[...]

    # affine1 on the MXU: (128, 8) @ (8, TB) -> (128, TB); only bias + ReLU on VPU.
    h = jnp.dot(w1_ref[...], xt, preferred_element_type=jnp.float32) + b1_ref[...]

    # dropout (eval mode) = identity, then ReLU.
    h = jnp.maximum(h, 0.0)

    # affine2 on the MXU: (2, 128) @ (128, TB) -> lane-dense (2, TB) logits.
    s = jnp.dot(w2_ref[...], h, preferred_element_type=jnp.float32) + b2_ref[...]

    # 2-class softmax == sigmoid of +/- the logit difference (EUP; no XLU reduce,
    # no divide; both rows exact).  Single lane-dense store of the (2, TB) slab.
    d = s[0:1, :] - s[1:2, :]
    out_ref[...] = jax.nn.sigmoid(jnp.concatenate([d, -d], axis=0))


def _round_up(n, m):
    return ((n + m - 1) // m) * m


@functools.partial(jax.jit, static_argnames=("tile_b",))
def policy_forward(x, w1, b1, w2, b2, *, tile_b=4096):
    """Forward pass.  x: (B, 4) f32.  Weights in torch layout:
    w1 (128, 4), b1 (128,), w2 (2, 128), b2 (2,).  Returns (B, 2) probabilities."""
    B = x.shape[0]

    # Batch tile on the lane axis: multiple of 128; large enough to amortize the
    # ~600-cycle per-grid-step overhead; >= 2 tiles when the batch allows so v7x's
    # two TensorCores both get work; hard-capped so the (128, TB) f32 hidden slab
    # (512*TB bytes) stays inside v5e's 16 MiB scoped-VMEM default.
    b_pad128 = _round_up(B, 128)
    tb = max(128, min(tile_b, _round_up(pl.cdiv(b_pad128, 2), 128), 16384))
    Bp = _round_up(B, tb)

    # Layout plumbing only: pad the batch, zero-pad K 4->8 (so the skinny layer-1
    # LHS needs no relayout on the MXU), and put the batch on the lane (last) axis.
    xT = jnp.pad(x, ((0, Bp - B), (0, K_PAD - IN_DIM))).T   # (8, Bp)
    w1p = jnp.pad(w1, ((0, 0), (0, K_PAD - IN_DIM)))        # (128, 8)
    b1c = b1.reshape(HIDDEN, 1)
    b2c = b2.reshape(N_ACTIONS, 1)

    weight_bytes = 4 * (w1p.size + b1.size + w2.size + b2.size)
    cost = pl.CostEstimate(
        flops=2 * Bp * (K_PAD * HIDDEN + HIDDEN * N_ACTIONS),
        transcendentals=N_ACTIONS * Bp,
        bytes_accessed=4 * Bp * (K_PAD + N_ACTIONS) + weight_bytes,
    )

    outT = pl.pallas_call(
        policy_kernel,
        out_shape=jax.ShapeDtypeStruct((N_ACTIONS, Bp), jnp.float32),
        grid=(Bp // tb,),
        in_specs=[
            pl.BlockSpec((K_PAD, tb), lambda i: (0, i)),         # x: streamed per tile
            pl.BlockSpec((HIDDEN, K_PAD), lambda i: (0, 0)),     # weights: VMEM-resident
            pl.BlockSpec((HIDDEN, 1), lambda i: (0, 0)),
            pl.BlockSpec((N_ACTIONS, HIDDEN), lambda i: (0, 0)),
            pl.BlockSpec((N_ACTIONS, 1), lambda i: (0, 0)),
        ],
        out_specs=pl.BlockSpec((N_ACTIONS, tb), lambda i: (0, i)),
        compiler_params=pltpu.CompilerParams(
            dimension_semantics=("parallel",),                   # megacore split on v7x
            allow_input_fusion=[True, False, False, False, False],  # fuse x's pad+transpose
        ),
        cost_estimate=cost,
    )(xT, w1p, b1c, w2, b2c)

    return outT[:, :B].T                                         # back to (B, 2)


def init_params(key):
    """PyTorch nn.Linear default init (U[-1/sqrt(fan_in), 1/sqrt(fan_in)]), torch layout."""
    k1, k2, k3, k4 = jax.random.split(key, 4)
    bound1 = 1.0 / jnp.sqrt(jnp.float32(IN_DIM))
    bound2 = 1.0 / jnp.sqrt(jnp.float32(HIDDEN))
    w1 = jax.random.uniform(k1, (HIDDEN, IN_DIM), jnp.float32, -bound1, bound1)
    b1 = jax.random.uniform(k2, (HIDDEN,), jnp.float32, -bound1, bound1)
    w2 = jax.random.uniform(k3, (N_ACTIONS, HIDDEN), jnp.float32, -bound2, bound2)
    b2 = jax.random.uniform(k4, (N_ACTIONS,), jnp.float32, -bound2, bound2)
    return w1, b1, w2, b2


def reference_forward(x, w1, b1, w2, b2):
    h = jnp.maximum(x @ w1.T + b1, 0.0)
    s = h @ w2.T + b2
    return jax.nn.softmax(s, axis=1)


if __name__ == "__main__":
    key = jax.random.PRNGKey(0)
    pkey, xkey1, xkey2 = jax.random.split(key, 3)
    w1, b1, w2, b2 = init_params(pkey)

    # Small CartPole-like batch (observation dim = 4).
    B = 8
    x = jax.random.normal(xkey1, (B, IN_DIM), jnp.float32)
    out = jax.block_until_ready(policy_forward(x, w1, b1, w2, b2))
    ref = reference_forward(x, w1, b1, w2, b2)
    assert out.shape == (B, N_ACTIONS)
    assert jnp.allclose(out, ref, atol=1e-5, rtol=1e-5)
    assert jnp.allclose(jnp.sum(out, axis=1), 1.0, atol=1e-5)

    # Ragged batch with a small tile to exercise the multi-tile grid + padding path.
    B2 = 300
    x2 = jax.random.normal(xkey2, (B2, IN_DIM), jnp.float32)
    out2 = jax.block_until_ready(policy_forward(x2, w1, b1, w2, b2, tile_b=128))
    ref2 = reference_forward(x2, w1, b1, w2, b2)
    assert out2.shape == (B2, N_ACTIONS)
    assert jnp.allclose(out2, ref2, atol=1e-5, rtol=1e-5)

    print("KERNEL_OK")
</pallas_src>

<mosaic_0001>
module attributes {stable_mosaic.version = 11 : i64} {
  func.func @policy_kernel(%arg0: i32, %arg1: memref<8x128xf32, #tpu.memory_space<vmem>>, %arg2: memref<128x8xf32, #tpu.memory_space<vmem>>, %arg3: memref<128x1xf32, #tpu.memory_space<vmem>>, %arg4: memref<2x128xf32, #tpu.memory_space<vmem>>, %arg5: memref<2x1xf32, #tpu.memory_space<vmem>>, %arg6: memref<2x128xf32, #tpu.memory_space<vmem>>) attributes {dimension_semantics = [#tpu.dimension_semantics<parallel>], iteration_bounds = array<i64: 1>, scalar_prefetch = 0 : i64, scratch_operands = 0 : i64, tpu.core_type = #tpu.core_type<tc>, window_params = [{transform_indices = @transform_0, window_bounds = array<i64: 8, 128>}, {pipeline_mode = #tpu.pipeline_mode<synchronous>, transform_indices = @transform_1, window_bounds = array<i64: 128, 8>}, {pipeline_mode = #tpu.pipeline_mode<synchronous>, transform_indices = @transform_2, window_bounds = array<i64: 128, 1>}, {pipeline_mode = #tpu.pipeline_mode<synchronous>, transform_indices = @transform_3, window_bounds = array<i64: 2, 128>}, {pipeline_mode = #tpu.pipeline_mode<synchronous>, transform_indices = @transform_4, window_bounds = array<i64: 2, 1>}, {transform_indices = @transform_5, window_bounds = array<i64: 2, 128>}]} {
    %c0 = arith.constant 0 : index
    %c0_0 = arith.constant 0 : index
    %0 = vector.load %arg1[%c0, %c0_0] : memref<8x128xf32, #tpu.memory_space<vmem>>, vector<8x128xf32>
    %c0_1 = arith.constant 0 : index
    %c0_2 = arith.constant 0 : index
    %1 = vector.load %arg2[%c0_1, %c0_2] : memref<128x8xf32, #tpu.memory_space<vmem>>, vector<128x8xf32>
    %cst = arith.constant dense<0.000000e+00> : vector<128x128xf32>
    %2 = tpu.matmul %1, %0, %cst {dimension_numbers = #tpu.dot_dimension_numbers<[1], [0], [0], [1], [0, 0, 1, 1], [], []>} : vector<128x8xf32>, vector<8x128xf32>, vector<128x128xf32> -> vector<128x128xf32>
    %c0_3 = arith.constant 0 : index
    %c0_4 = arith.constant 0 : index
    %3 = vector.load %arg3[%c0_3, %c0_4] : memref<128x1xf32, #tpu.memory_space<vmem>>, vector<128x1xf32>
    %4 = vector.broadcast %3 : vector<128x1xf32> to vector<128x128xf32>
    %5 = arith.addf %2, %4 : vector<128x128xf32>
    %cst_5 = arith.constant 0.000000e+00 : f32
    %6 = vector.broadcast %cst_5 : f32 to vector<128x128xf32>
    %7 = arith.maximumf %5, %6 : vector<128x128xf32>
    %c0_6 = arith.constant 0 : index
    %c0_7 = arith.constant 0 : index
    %8 = vector.load %arg4[%c0_6, %c0_7] : memref<2x128xf32, #tpu.memory_space<vmem>>, vector<2x128xf32>
    %cst_8 = arith.constant dense<0.000000e+00> : vector<2x128xf32>
    %9 = tpu.matmul %8, %7, %cst_8 {dimension_numbers = #tpu.dot_dimension_numbers<[1], [0], [0], [1], [0, 0, 1, 1], [], []>} : vector<2x128xf32>, vector<128x128xf32>, vector<2x128xf32> -> vector<2x128xf32>
    %c0_9 = arith.constant 0 : index
    %c0_10 = arith.constant 0 : index
    %10 = vector.load %arg5[%c0_9, %c0_10] : memref<2x1xf32, #tpu.memory_space<vmem>>, vector<2x1xf32>
    %11 = vector.broadcast %10 : vector<2x1xf32> to vector<2x128xf32>
    %12 = arith.addf %9, %11 : vector<2x128xf32>
    %13 = vector.extract_strided_slice %12 {offsets = [0, 0], sizes = [1, 128], strides = [1, 1]} : vector<2x128xf32> to vector<1x128xf32>
    %14 = vector.extract_strided_slice %12 {offsets = [1, 0], sizes = [1, 128], strides = [1, 1]} : vector<2x128xf32> to vector<1x128xf32>
    %15 = arith.subf %13, %14 : vector<1x128xf32>
    %cst_11 = arith.constant 0.000000e+00 : f32
    %16 = vector.broadcast %cst_11 : f32 to vector<1x128xf32>
    %17 = arith.subf %16, %15 : vector<1x128xf32>
    %18 = tpu.concatenate %15, %17 in 0 : vector<1x128xf32>, vector<1x128xf32> -> vector<2x128xf32>
    %19 = arith.negf %18 : vector<2x128xf32>
    %20 = math.exp %19 : vector<2x128xf32>
    %cst_12 = arith.constant 1.000000e+00 : f32
    %21 = vector.broadcast %cst_12 : f32 to vector<2x128xf32>
    %22 = arith.addf %21, %20 : vector<2x128xf32>
    %23 = arith.divf %21, %22 : vector<2x128xf32>
    %c0_13 = arith.constant 0 : index
    %c0_14 = arith.constant 0 : index
    %24 = vector.load %arg6[%c0_13, %c0_14] : memref<2x128xf32, #tpu.memory_space<vmem>>, vector<2x128xf32>
    tpu.vector_store %arg6[%c0_13, %c0_14], %23 {strides = array<i32>} : memref<2x128xf32, #tpu.memory_space<vmem>>, vector<2x128xf32>,
    return
  }
  func.func @transform_0(%arg0: i32) -> (i32, i32) {
    %c0_i32 = arith.constant 0 : i32
    %c0_i32_0 = arith.constant 0 : i32
    return %c0_i32, %arg0 : i32, i32
  }
  func.func @transform_1(%arg0: i32) -> (i32, i32) {
    %c0_i32 = arith.constant 0 : i32
    %c0_i32_0 = arith.constant 0 : i32
    %c0_i32_1 = arith.constant 0 : i32
    return %c0_i32, %c0_i32_0 : i32, i32
  }
  func.func @transform_2(%arg0: i32) -> (i32, i32) {
    %c0_i32 = arith.constant 0 : i32
    %c0_i32_0 = arith.constant 0 : i32
    %c0_i32_1 = arith.constant 0 : i32
    return %c0_i32, %c0_i32_0 : i32, i32
  }
  func.func @transform_3(%arg0: i32) -> (i32, i32) {
    %c0_i32 = arith.constant 0 : i32
    %c0_i32_0 = arith.constant 0 : i32
    %c0_i32_1 = arith.constant 0 : i32
    return %c0_i32, %c0_i32_0 : i32, i32
  }
  func.func @transform_4(%arg0: i32) -> (i32, i32) {
    %c0_i32 = arith.constant 0 : i32
    %c0_i32_0 = arith.constant 0 : i32
    %c0_i32_1 = arith.constant 0 : i32
    return %c0_i32, %c0_i32_0 : i32, i32
  }
  func.func @transform_5(%arg0: i32) -> (i32, i32) {
    %c0_i32 = arith.constant 0 : i32
    %c0_i32_0 = arith.constant 0 : i32
    return %c0_i32, %arg0 : i32, i32
  }
}

</mosaic_0001>

<bundles_post_ra>
// kernel: policy_forward.2
= control target key start
LH: loop header
LB: loop body
LE: loop exit
PB: predicated region body
PF: predicated region fallthrough
CT: control target
= control target key end

     0   :  { %v23_v2 = vlaneseq  ;;  %v367_v3 = vmov 0   ;;  %vm149_vm2 = vcmask 64512   ;;  %vm314_vm3 = vcmask 1040384   ;;  %s536_s0 = inlined_call_operand.vmem [shape: f32[128,8], index: 0, kind: input, shape index: {}]   ;;  %s537_s1 = inlined_call_operand.vmem [shape: f32[128,1], index: 1, kind: input, shape index: {}]   ;;  %s538_s2 = inlined_call_operand.vmem [shape: f32[2,128], index: 2, kind: input, shape index: {}]   ;;  %s539_s3 = inlined_call_operand.vmem [shape: f32[2,1], index: 3, kind: input, shape index: {}]   ;;  %s540_s4 = inlined_call_operand.vmem [shape: f32[8,4], index: 4, kind: input, shape index: {}]   ;;  %s541_s5 = inlined_call_operand.<no memory space> [shape: f32[], index: 5, kind: input, shape index: {}]   ;;  %s542_s6 = inlined_call_operand.vmem [shape: f32[2,128], index: 6, kind: output, shape index: {}]  }
   0x1   :  { %v11_v0 = vstv %s541_s5  ;;  %v68_v1 = vld [vmem:[%s537_s1 + $0x78] sm:$0xff]  ;;  %360 = vset.pattern.permute.xlu0 %v367_v3  ;;  %361 = vset.pattern.permute.xlu1 %v367_v3  ;;  %v22_v4 = vld [vmem:[%s540_s4] sm:$0xf]  ;;  %v66_v7 = vld [vmem:[%s537_s1 + $0x68] sm:$0xff] }
   0x2   :  { %146 = vperm.xlu0 %360, %v68_v1   ;;  %v24_v5 = vshrl.u32 %v23_v2, 7  ;;  %v29_v6 = vand.u32 127, %v23_v2  ;;  %362 = vset.pattern.permute.xlu2 %v367_v3  ;;  %v37_v9 = vld [vmem:[%s536_s0] sm:$0xff]  ;;  %v43_v11 = vld [vmem:[%s536_s0 + $0x30] sm:$0xff]  ;;  %v64_v14 = vld [vmem:[%s537_s1 + $0x58] sm:$0xff] }
   0x3   :  { %136 = vperm.xlu1 %361, %v66_v7   ;;  %v49_v12 = vld [vmem:[%s536_s0 + $0x60] sm:$0xff]  ;;  %v67_v13 = vld [vmem:[%s537_s1 + $0x70] sm:$0xff]  ;;  %126 = vperm.xlu2 %362, %v64_v14   ;;  %v38_v16 = vld [vmem:[%s536_s0 + $0x8] sm:$0xff] }
   0x4   :  { %vm26_vm0 = vcmp.lt.s32.totalorder %v24_v5, 4  ;;  %vm31_vm1 = vcmp.lt.s32.totalorder %v29_v6, 8  ;;  %v65_v15 = vld [vmem:[%s537_s1 + $0x60] sm:$0xff]  ;;  %v44_v17 = vld [vmem:[%s536_s0 + $0x38] sm:$0xff]  ;;  %v50_v18 = vld [vmem:[%s536_s0 + $0x68] sm:$0xff] }
   0x5   :  { %v27_v8 = vsel %vm26_vm0, %v22_v4, %v11_v0  ;;  %v62_v19 = vld [vmem:[%s537_s1 + $0x48] sm:$0xff]  ;;  %v63_v20 = vld [vmem:[%s537_s1 + $0x50] sm:$0xff]  ;;  %v61_v21 = vld [vmem:[%s537_s1 + $0x40] sm:$0xff] }
   0x6   :  { %v32_v10 = vsel %vm31_vm1, %v27_v8, %v11_v0  ;;  %v39_v22 = vld [vmem:[%s536_s0 + $0x10] sm:$0xff]  ;;  %v45_v23 = vld [vmem:[%s536_s0 + $0x40] sm:$0xff]  ;;  %v60_v26 = vld [vmem:[%s537_s1 + $0x38] sm:$0xff] }
   0x7   :  { %213 = vmatpush.msra.mxu0 %v32_v10  ;;  %357 = vmatpush.msra.mxu2 %v32_v10  ;;  %v51_v24 = vld [vmem:[%s536_s0 + $0x70] sm:$0xff]  ;;  %v58_v27 = vld [vmem:[%s537_s1 + $0x28] sm:$0xff]  ;;  %v40_v28 = vld [vmem:[%s536_s0 + $0x18] sm:$0xff] }
   0x8   :  { %358 = vmatpush.msra.mxu3 %v32_v10  ;;  %340 = vmatmul.msk.f32.vlgmr.msra.gmra.mxu0 %vm149_vm2, %v37_v9  ;;  %v59_v25 = vld [vmem:[%s537_s1 + $0x30] sm:$0xff]  ;;  %v46_v29 = vld [vmem:[%s536_s0 + $0x48] sm:$0xff]  ;;  %v52_v30 = vld [vmem:[%s536_s0 + $0x78] sm:$0xff] }
   0x9   :  { %346 = vmatmul.msk.f32.vlgmr.msra.gmra.mxu2 %vm149_vm2, %v43_v11  ;;  %352 = vmatmul.msk.f32.vlgmr.msra.gmra.mxu3 %vm149_vm2, %v49_v12  ;;  %v56_v31 = vld [vmem:[%s537_s1 + $0x18] sm:$0xff]  ;;  %v57_v32 = vld [vmem:[%s537_s1 + $0x20] sm:$0xff]  ;;  %v55_v33 = vld [vmem:[%s537_s1 + $0x10] sm:$0xff] }
   0xa   :  { %141 = vperm.xlu0 %360, %v67_v13   ;;  %v41_v34 = vld [vmem:[%s536_s0 + $0x20] sm:$0xff]  ;;  %v47_v35 = vld [vmem:[%s536_s0 + $0x50] sm:$0xff]  ;;  %v54_v37 = vld [vmem:[%s537_s1 + $0x8] sm:$0xff] }
   0xb   :  { %131 = vperm.xlu1 %361, %v65_v15   ;;  %121 = vperm.xlu2 %362, %v63_v20   ;;  %v53_v36 = vld [vmem:[%s537_s1] sm:$0xff]  ;;  %v42_v39 = vld [vmem:[%s536_s0 + $0x28] sm:$0xff]  ;;  %v48_v40 = vld [vmem:[%s536_s0 + $0x58] sm:$0xff] }
   0xc   :  { %v280_v38 = vld [vmem:[%s539_s3] sm:$0x3] }
  0x10   :  { %341 = vmatmul.msk.f32.gmra.mxu0 %vm149_vm2, %v38_v16 }
  0x11   :  { %347 = vmatmul.msk.f32.gmra.mxu2 %vm149_vm2, %v44_v17  ;;  %353 = vmatmul.msk.f32.gmra.mxu3 %vm149_vm2, %v50_v18 }
  0x12   :  { %116 = vperm.xlu0 %360, %v62_v19  }
  0x13   :  { %111 = vperm.xlu1 %361, %v61_v21   ;;  %106 = vperm.xlu2 %362, %v60_v26  }
  0x18   :  { %342 = vmatmul.msk.f32.gmra.mxu0 %vm149_vm2, %v39_v22 }
  0x19   :  { %348 = vmatmul.msk.f32.gmra.mxu2 %vm149_vm2, %v45_v23  ;;  %354 = vmatmul.msk.f32.gmra.mxu3 %vm149_vm2, %v51_v24 }
  0x1a   :  { %101 = vperm.xlu0 %360, %v59_v25  }
  0x1b   :  { %96 = vperm.xlu1 %361, %v58_v27   ;;  %91 = vperm.xlu2 %362, %v57_v32  }
  0x20   :  { %343 = vmatmul.msk.f32.gmra.mxu0 %vm149_vm2, %v40_v28 }
  0x21   :  { %349 = vmatmul.msk.f32.gmra.mxu2 %vm149_vm2, %v46_v29  ;;  %355 = vmatmul.msk.f32.gmra.mxu3 %vm149_vm2, %v52_v30 }
  0x22   :  { %86 = vperm.xlu0 %360, %v56_v31  }
  0x23   :  { %81 = vperm.xlu1 %361, %v55_v33   ;;  %76 = vperm.xlu2 %362, %v54_v37  }
  0x28   :  { %344 = vmatmul.msk.f32.gmra.mxu0 %vm149_vm2, %v41_v34 }
  0x29   :  { %350 = vmatmul.msk.f32.gmra.mxu2 %vm149_vm2, %v47_v35 }
  0x2a   :  { %71 = vperm.xlu0 %360, %v53_v36  }
  0x2b   :  { %283 = vperm.xlu1 %361, %v280_v38  }
  0x30   :  { %345 = vmatmul.msk.f32.gmra.mxu0 %vm149_vm2, %v42_v39 }
  0x31   :  { %351 = vmatmul.msk.f32.gmra.mxu2 %vm149_vm2, %v48_v40 }
  0x5d   :  { %v127_v49 = vpop.permute.xlu2 %126 }
  0x65   :  { %v122_v59 = vpop.permute.xlu2 %121 }
  0x6d   :  { %v107_v6 = vpop.permute.xlu2 %106 }
  0x74   :  { %v147_v44 = vpop.permute.xlu0 %146 }
  0x75   :  { %v137_v48 = vpop.permute.xlu1 %136  ;;  %v92_v17 = vpop.permute.xlu2 %91 }
  0x7c   :  { %v142_v52 = vpop.permute.xlu0 %141 }
  0x7d   :  { %v132_v58 = vpop.permute.xlu1 %131  ;;  %v77_v31 = vpop.permute.xlu2 %76 }
  0x84   :  { %v117_v62 = vpop.permute.xlu0 %116 }
  0x85   :  { %v524_v41 = vpop.f32.mrf.mxu0  ;;  %v112_v5 = vpop.permute.xlu1 %111 }
  0x8c   :  { %v233_v42 = vpop.f32.mrf.mxu2  ;;  %v251_v43 = vpop.f32.mrf.mxu3 }
  0x8d   :  { %v526_v45 = vpop.f32.mrf.mxu0  ;;  %v252_v0 = vadd.f32 %v251_v43, %v132_v58  ;;  %v102_v7 = vpop.permute.xlu0 %101 }
  0x8e   :  { %v97_v16 = vpop.permute.xlu1 %96  ;;  %v234_v22 = vadd.f32 %v233_v42, %v102_v7  ;;  %v219_v36 = vadd.f32 %v526_v45, %v77_v31  ;;  %v279_v42 = vld [vmem:[%s538_s2] sm:$0x3] }
  0x8f   :  { %v275_v4 = vmax.f32 %v252_v0, 0.0 }
  0x90   :  { %v269_v26 = vmax.f32 %v234_v22, 0.0  ;;  %v264_v39 = vmax.f32 %v219_v36, 0.0 }
  0x94   :  { %v236_v46 = vpop.f32.mrf.mxu2  ;;  %v254_v47 = vpop.f32.mrf.mxu3 }
  0x95   :  { %v221_v53 = vpop.f32.mrf.mxu0  ;;  %v255_v60 = vadd.f32 %v254_v47, %v137_v48  ;;  %v237_v18 = vadd.f32 %v236_v46, %v107_v6  ;;  %v87_v20 = vpop.permute.xlu0 %86 }
  0x96   :  { %v82_v30 = vpop.permute.xlu1 %81 }
  0x97   :  { %v276_v2 = vmax.f32 %v255_v60, 0.0  ;;  %v270_v24 = vmax.f32 %v237_v18, 0.0  ;;  %v222_v32 = vadd.f32 %v221_v53, %v82_v30 }
  0x99   :  { %v265_v38 = vmax.f32 %v222_v32, 0.0 }
  0x9c   :  { %v239_v50 = vpop.f32.mrf.mxu2  ;;  %v257_v51 = vpop.f32.mrf.mxu3 }
  0x9d   :  { %v258_v56 = vadd.f32 %v257_v51, %v142_v52  ;;  %v224_v63 = vpop.f32.mrf.mxu0  ;;  %v240_v14 = vadd.f32 %v239_v50, %v112_v5  ;;  %v72_v34 = vpop.permute.xlu0 %71 }
  0x9e   :  { %v225_v28 = vadd.f32 %v224_v63, %v87_v20  ;;  %v216_v37 = vadd.f32 %v524_v41, %v72_v34  ;;  %v284_v43 = vpop.permute.xlu1 %283 }
  0x9f   :  { %v277_v1 = vmax.f32 %v258_v56, 0.0  ;;  %v271_v23 = vmax.f32 %v240_v14, 0.0 }
  0xa0   :  { %v266_v35 = vmax.f32 %v225_v28, 0.0  ;;  %v263_v40 = vmax.f32 %v216_v37, 0.0 }
  0xa4   :  { %v242_v54 = vpop.f32.mrf.mxu2  ;;  %v260_v55 = vpop.f32.mrf.mxu3 }
  0xa5   :  { %v261_v57 = vadd.f32 %v260_v55, %v147_v44  ;;  %v227_v8 = vpop.f32.mrf.mxu0  ;;  %v243_v12 = vadd.f32 %v242_v54, %v117_v62 }
  0xa6   :  { %v228_v27 = vadd.f32 %v227_v8, %v92_v17 }
  0xa7   :  { %v278_v61 = vmax.f32 %v261_v57, 0.0  ;;  %v272_v19 = vmax.f32 %v243_v12, 0.0 }
  0xa8   :  { %v267_v33 = vmax.f32 %v228_v27, 0.0 }
  0xa9   :  { %286 = vmatpush.msra.mxu1 %v278_v61 }
  0xab   :  { %287 = vmatpush.msra.mxu1 %v277_v1 }
  0xac   :  { %v245_v3 = vpop.f32.mrf.mxu2 }
  0xad   :  { %288 = vmatpush.msra.mxu1 %v276_v2  ;;  %v246_v10 = vadd.f32 %v245_v3, %v122_v59  ;;  %v230_v21 = vpop.f32.mrf.mxu0 }
  0xae   :  { %v231_v25 = vadd.f32 %v230_v21, %v97_v16 }
  0xaf   :  { %289 = vmatpush.msra.mxu1 %v275_v4  ;;  %v273_v15 = vmax.f32 %v246_v10, 0.0 }
  0xb0   :  { %v268_v29 = vmax.f32 %v231_v25, 0.0 }
  0xb4   :  { %v248_v9 = vpop.f32.mrf.mxu2 }
  0xb5   :  { %v249_v11 = vadd.f32 %v248_v9, %v127_v49 }
  0xb7   :  { %v274_v13 = vmax.f32 %v249_v11, 0.0 }
  0xb9   :  { %290 = vmatpush.msra.mxu1 %v274_v13 }
  0xbb   :  { %291 = vmatpush.msra.mxu1 %v273_v15 }
  0xbd   :  { %292 = vmatpush.msra.mxu1 %v272_v19 }
  0xbf   :  { %293 = vmatpush.msra.mxu1 %v271_v23 }
  0xc1   :  { %294 = vmatpush.msra.mxu1 %v270_v24 }
  0xc3   :  { %295 = vmatpush.msra.mxu1 %v269_v26 }
  0xc5   :  { %296 = vmatpush.msra.mxu1 %v268_v29 }
  0xc7   :  { %297 = vmatpush.msra.mxu1 %v267_v33 }
  0xc9   :  { %298 = vmatpush.msra.mxu1 %v266_v35 }
  0xcb   :  { %299 = vmatpush.msra.mxu1 %v265_v38 }
  0xcd   :  { %300 = vmatpush.msra.mxu1 %v264_v39 }
  0xcf   :  { %301 = vmatpush.msra.mxu1 %v263_v40 }
  0xd0   :  { %302 = vmatmul.f32.vlgmr.msra.gmra.mxu1 %v279_v42 }
 0x14d   :  { %v303_v44 = vpop.f32.mrf.mxu1 }
 0x14e   :  { %v304_v46 = vadd.f32 %v303_v44, %v284_v43 }
 0x150   :  { %v307_v47 = vrot.slane %v304_v46, 1 }
 0x152   :  { %v309_v45 = vsub.f32 %v304_v46, %v307_v47 }
 0x154   :  { %v310_v48 = vsub.f32 0.0, %v309_v45 }
 0x156   :  { %v312_v41 = vrot.slane %v310_v48, 7 }
 0x158   :  { %v315_v49 = vsel %vm314_vm3, %v309_v45, %v312_v41 }
 0x159   :  { %v356_v50 = vmul.f32 -1.442695, %v315_v49 }
 0x15b   :  { %363 = vpow2.f32 %v356_v50 }
 0x161   :  { %v364_v51 = vpop.eup %363 }
 0x162   :  { %v319_v52 = vadd.f32 1.0, %v364_v51 }
 0x164   :  { %365 = vrcp.f32 %v319_v52  ;;  %v331_v56 = vand.u32 2147483648, %v319_v52  ;;  %v329_v58 = vand.u32 2147483647, %v319_v52  ;;  %vm325_vm5 = vweird.f32 %v319_v52 }
 0x166   :  { %v332_v60 = vor.u32 1.1754944e-38, %v331_v56  ;;  %vm330_vm7 = vcmp.eq.f32.partialorder %v329_v58, 8.507059e+37 }
 0x16a   :  { %v366_v53 = vpop.eup %365 }
 0x16b   :  { %v321_v54 = vmul.f32 %v366_v53, %v319_v52  ;;  %vm326_vm4 = vweird.f32 %v366_v53 }
 0x16c   :  { %vm327_vm6 = vmor %vm325_vm5, %vm326_vm4 }
 0x16d   :  { %v322_v55 = vsub.f32 1.0, %v321_v54 }
 0x16f   :  { %v323_v57 = vmul.f32 %v366_v53, %v322_v55 }
 0x171   :  { %v324_v59 = vadd.f32 %v366_v53, %v323_v57 }
 0x173   :  { %v328_v61 = vsel %vm327_vm6, %v366_v53, %v324_v59 }
 0x174   :  { %v333_v62 = vsel %vm330_vm7, %v332_v60, %v328_v61 }
 0x175   :  { %335 = vst [vmem:[%s542_s6] sm:$0x3] %v333_v62 }

</bundles_post_ra>
